<compile_context>
chip_gen: v7x
topology: tpu7x:2x2x1
jax: 0.10.0
libtpu: 0.0.40
codegen_flags: <defaults>
</compile_context>

<pallas_src>
import functools

import jax
import jax.numpy as jnp
from jax import lax
from jax.experimental import pallas as pl
from jax.experimental.pallas import tpu as pltpu


def _round_up(x, m):
    return ((x + m - 1) // m) * m


# ---------------------------------------------------------------------------
# Pallas kernel: all TS_Encoder blocks fused, one lane-dense matmul per block.
# ---------------------------------------------------------------------------
def _fused_affine_kernel(z_ref, w_ref, b_ref, out_ref, *, n_blocks):
    """z_ref/out_ref: [tm, Lp]; w_ref: [n_blocks, Lp, Lp]; b_ref: [n_blocks, 1, Lp].

    The whole weight stack is VMEM-resident; blocks are applied with an
    unrolled in-kernel loop, so there is exactly one HBM load and one HBM
    store of the activations for the entire encoder stack.
    """
    def body(i, z):
        return jnp.dot(z, w_ref[i], preferred_element_type=jnp.float32) + b_ref[i]

    out_ref[...] = lax.fori_loop(0, n_blocks, body, z_ref[...], unroll=True)


def run_fused_blocks(z, w_all, b_all, *, tile_m):
    """One pallas_call covering every TS_Encoder block."""
    Mp, Lp = z.shape
    n_blocks = w_all.shape[0]
    kernel = functools.partial(_fused_affine_kernel, n_blocks=n_blocks)
    return pl.pallas_call(
        kernel,
        out_shape=jax.ShapeDtypeStruct((Mp, Lp), jnp.float32),
        grid_spec=pltpu.PrefetchScalarGridSpec(
            num_scalar_prefetch=0,
            grid=(Mp // tile_m,),
            in_specs=[
                pl.BlockSpec((tile_m, Lp), lambda m: (m, 0)),        # activation slab
                pl.BlockSpec((n_blocks, Lp, Lp), lambda m: (0, 0, 0)),  # folded weights
                pl.BlockSpec((n_blocks, 1, Lp), lambda m: (0, 0, 0)),   # folded biases
            ],
            out_specs=pl.BlockSpec((tile_m, Lp), lambda m: (m, 0)),
        ),
        input_output_aliases={0: 0},
        compiler_params=pltpu.CompilerParams(
            dimension_semantics=("parallel",)),
    )(z, w_all, b_all)


# ---------------------------------------------------------------------------
# Parameter init + per-block affine folding (done once, not per forward call).
# ---------------------------------------------------------------------------
def _pack_complex_weight(wr, wi):
    """[xr|xi] @ [[Wr, Wi], [-Wi, Wr]] == [xr*Wr - xi*Wi | xr*Wi + xi*Wr]."""
    top = jnp.concatenate([wr, wi], axis=1)
    bot = jnp.concatenate([-wi, wr], axis=1)
    return jnp.concatenate([top, bot], axis=0)


def _fold_block(wdt_r, wdt_i, bdt_r, bdt_i, wtd_r, wtd_i, btd_r, btd_i, lane_pad):
    """Fold one TS_Encoder block into a single affine map on [t0_re|t0_im|s_re|s_im].

        t0' = t0 + s @ Wdt + bdt
        s'  = s + t0' @ Wtd + btd
      =>  [t0'|s'] = [t0|s] @ [[I, Wtd], [Wdt, I + Wdt@Wtd]] + [bdt | bdt@Wtd + btd]
    """
    D, T = wdt_r.shape
    two_t, two_d = 2 * T, 2 * D
    L = two_t + two_d
    wdt_p = _pack_complex_weight(wdt_r, wdt_i)            # [2D, 2T]
    wtd_p = _pack_complex_weight(wtd_r, wtd_i)            # [2T, 2D]
    bdt_p = jnp.concatenate([bdt_r, bdt_i])[None, :]      # [1, 2T]
    btd_p = jnp.concatenate([btd_r, btd_i])[None, :]      # [1, 2D]

    w = jnp.zeros((L, L), jnp.float32)
    w = w.at[:two_t, :two_t].set(jnp.eye(two_t, dtype=jnp.float32))
    w = w.at[:two_t, two_t:].set(wtd_p)
    w = w.at[two_t:, :two_t].set(wdt_p)
    w = w.at[two_t:, two_t:].set(jnp.eye(two_d, dtype=jnp.float32) + wdt_p @ wtd_p)
    b = jnp.concatenate([bdt_p, bdt_p @ wtd_p + btd_p], axis=-1)   # [1, L]

    # Zero-pad to a lane-dense size; padded lanes stay zero under the map.
    w_pad = jnp.zeros((lane_pad, lane_pad), jnp.float32).at[:L, :L].set(w)
    b_pad = jnp.zeros((1, lane_pad), jnp.float32).at[:, :L].set(b)
    return w_pad, b_pad


def init_params(key, N, F, T, D, n_blocks):
    ks = jax.random.split(key, 2 + n_blocks)
    params = {
        # nn.Parameter(torch.zeros(...)) counterparts
        "fct_real": jnp.zeros((1, N, 1, T), jnp.float32),
        "fct_imag": jnp.zeros((1, N, 1, T), jnp.float32),
        "fpe_real": jnp.zeros((1, 1, F + 1, T), jnp.float32),
        "fpe_imag": jnp.zeros((1, 1, F + 1, T), jnp.float32),
        "sct_real": jnp.zeros((1, 1, 1, D), jnp.float32),
        "sct_imag": jnp.zeros((1, 1, 1, D), jnp.float32),
        # nn.Parameter(torch.rand(...)) counterparts
        "se_real": jax.random.uniform(ks[0], (1, N, 1, D), jnp.float32),
        "se_imag": jax.random.uniform(ks[1], (1, N, 1, D), jnp.float32),
    }

    raw = {k: [] for k in ("wdt_r", "wdt_i", "bdt_r", "bdt_i",
                           "wtd_r", "wtd_i", "btd_r", "btd_i")}
    lane_pad = _round_up(2 * T + 2 * D, 128)
    w_folded, b_folded = [], []
    for blk in range(n_blocks):
        kb = jax.random.split(ks[2 + blk], 8)
        # ComplexLinear(D, T) / ComplexLinear(T, D) weights stored as [in, out].
        wdt_r = jax.random.normal(kb[0], (D, T), jnp.float32) / jnp.sqrt(float(D))
        wdt_i = jax.random.normal(kb[1], (D, T), jnp.float32) / jnp.sqrt(float(D))
        wtd_r = jax.random.normal(kb[2], (T, D), jnp.float32) / jnp.sqrt(float(T))
        wtd_i = jax.random.normal(kb[3], (T, D), jnp.float32) / jnp.sqrt(float(T))
        bdt_r = 0.1 * jax.random.normal(kb[4], (T,), jnp.float32)
        bdt_i = 0.1 * jax.random.normal(kb[5], (T,), jnp.float32)
        btd_r = 0.1 * jax.random.normal(kb[6], (D,), jnp.float32)
        btd_i = 0.1 * jax.random.normal(kb[7], (D,), jnp.float32)
        for name, val in (("wdt_r", wdt_r), ("wdt_i", wdt_i),
                          ("bdt_r", bdt_r), ("bdt_i", bdt_i),
                          ("wtd_r", wtd_r), ("wtd_i", wtd_i),
                          ("btd_r", btd_r), ("btd_i", btd_i)):
            raw[name].append(val)
        w_p, b_p = _fold_block(wdt_r, wdt_i, bdt_r, bdt_i,
                               wtd_r, wtd_i, btd_r, btd_i, lane_pad)
        w_folded.append(w_p)
        b_folded.append(b_p)

    params["raw_blocks"] = {k: jnp.stack(v) for k, v in raw.items()}
    params["w_folded"] = jnp.stack(w_folded)   # [n_blocks, Lp, Lp]
    params["b_folded"] = jnp.stack(b_folded)   # [n_blocks, 1, Lp]
    return params


# ---------------------------------------------------------------------------
# Forward pass (embedding assembly is glue JAX; encoder stack is the kernel).
# ---------------------------------------------------------------------------
@jax.jit
def wavelet_tf_forward(x_real, x_imag, params):
    B, N, F, T = x_real.shape
    D = params["se_real"].shape[-1]
    Np1 = N + 1

    # ---- embedding assembly (matches the PyTorch module) ----
    fct_r = jnp.broadcast_to(params["fct_real"], (B, N, 1, T))
    fct_i = jnp.broadcast_to(params["fct_imag"], (B, N, 1, T))
    temp_r = jnp.concatenate([fct_r, x_real], axis=2) + params["fpe_real"]
    temp_i = jnp.concatenate([fct_i, x_imag], axis=2) + params["fpe_imag"]
    # F.pad(temp_emb, (0,0,0,0,1,0)): zero channel prepended -> [B, N+1, F+1, T]
    temp_r = jnp.pad(temp_r, ((0, 0), (1, 0), (0, 0), (0, 0)))
    temp_i = jnp.pad(temp_i, ((0, 0), (1, 0), (0, 0), (0, 0)))

    se_r = jnp.broadcast_to(params["se_real"], (B, N, 1, D))
    se_i = jnp.broadcast_to(params["se_imag"], (B, N, 1, D))
    sct_r = jnp.broadcast_to(params["sct_real"], (B, 1, 1, D))
    sct_i = jnp.broadcast_to(params["sct_imag"], (B, 1, 1, D))
    spat_r = jnp.concatenate([sct_r, se_r], axis=1)   # [B, N+1, 1, D]
    spat_i = jnp.concatenate([sct_i, se_i], axis=1)

    # Only frequency row 0 of temp_emb is touched by the encoder stack
    # (TemporalEnc == identity).  Pack [t0_re | t0_im | s_re | s_im] once.
    M = B * Np1
    L = 2 * T + 2 * D
    Lp = _round_up(L, 128)
    tile_m = 256 if M > 256 else _round_up(M, 8)
    Mp = _round_up(M, tile_m)

    z = jnp.concatenate(
        [temp_r[:, :, 0, :].reshape(M, T),
         temp_i[:, :, 0, :].reshape(M, T),
         spat_r.reshape(M, D),
         spat_i.reshape(M, D)], axis=-1)               # [M, L]
    z = jnp.pad(z, ((0, Mp - M), (0, Lp - L)))         # lane/sublane-dense slab

    # ---- single fused Pallas kernel over all blocks ----
    z = run_fused_blocks(z, params["w_folded"], params["b_folded"],
                         tile_m=tile_m)
    z = z[:M]

    # Single write-back of the updated frequency row 0 after all blocks.
    temp_r = temp_r.at[:, :, 0, :].set(z[:, 0:T].reshape(B, Np1, T))
    temp_i = temp_i.at[:, :, 0, :].set(z[:, T:2 * T].reshape(B, Np1, T))
    spat_r = z[:, 2 * T:2 * T + D].reshape(B, Np1, 1, D)
    spat_i = z[:, 2 * T + D:L].reshape(B, Np1, 1, D)
    return temp_r, temp_i, spat_r, spat_i


# ---------------------------------------------------------------------------
# Pure-JAX reference (un-fused, real/imag explicit) for correctness checking.
# ---------------------------------------------------------------------------
def reference_forward(x_real, x_imag, params):
    B, N, F, T = x_real.shape
    D = params["se_real"].shape[-1]

    fct_r = jnp.broadcast_to(params["fct_real"], (B, N, 1, T))
    fct_i = jnp.broadcast_to(params["fct_imag"], (B, N, 1, T))
    temp_r = jnp.concatenate([fct_r, x_real], axis=2) + params["fpe_real"]
    temp_i = jnp.concatenate([fct_i, x_imag], axis=2) + params["fpe_imag"]
    temp_r = jnp.pad(temp_r, ((0, 0), (1, 0), (0, 0), (0, 0)))
    temp_i = jnp.pad(temp_i, ((0, 0), (1, 0), (0, 0), (0, 0)))

    se_r = jnp.broadcast_to(params["se_real"], (B, N, 1, D))
    se_i = jnp.broadcast_to(params["se_imag"], (B, N, 1, D))
    sct_r = jnp.broadcast_to(params["sct_real"], (B, 1, 1, D))
    sct_i = jnp.broadcast_to(params["sct_imag"], (B, 1, 1, D))
    spat_r = jnp.concatenate([sct_r, se_r], axis=1)
    spat_i = jnp.concatenate([sct_i, se_i], axis=1)

    raw = params["raw_blocks"]
    n_blocks = raw["wdt_r"].shape[0]
    for b in range(n_blocks):
        wdt_r, wdt_i = raw["wdt_r"][b], raw["wdt_i"][b]
        bdt_r, bdt_i = raw["bdt_r"][b], raw["bdt_i"][b]
        wtd_r, wtd_i = raw["wtd_r"][b], raw["wtd_i"][b]
        btd_r, btd_i = raw["btd_r"][b], raw["btd_i"][b]
        # temp_emb += pad(D_to_T(spat_emb), (0,0,0,F))  -> only freq row 0 changes
        dtr = spat_r @ wdt_r - spat_i @ wdt_i + bdt_r
        dti = spat_r @ wdt_i + spat_i @ wdt_r + bdt_i
        temp_r = temp_r.at[:, :, :1, :].add(dtr)
        temp_i = temp_i.at[:, :, :1, :].add(dti)
        # TemporalEnc == identity
        t0r = temp_r[:, :, :1, :]
        t0i = temp_i[:, :, :1, :]
        spat_r = spat_r + (t0r @ wtd_r - t0i @ wtd_i + btd_r)
        spat_i = spat_i + (t0r @ wtd_i + t0i @ wtd_r + btd_i)
        # SpatialEnc == identity
    return temp_r, temp_i, spat_r, spat_i


if __name__ == "__main__":
    B, N, F, T, D = 2, 4, 8, 16, 32
    n_blocks = 2

    key = jax.random.PRNGKey(0)
    kx, ky, kp = jax.random.split(key, 3)
    x_real = jax.random.normal(kx, (B, N, F, T), jnp.float32)
    x_imag = jax.random.normal(ky, (B, N, F, T), jnp.float32)
    params = init_params(kp, N, F, T, D, n_blocks)

    outs = wavelet_tf_forward(x_real, x_imag, params)
    jax.block_until_ready(outs)
    temp_r, temp_i, spat_r, spat_i = outs

    assert temp_r.shape == (B, N + 1, F + 1, T)
    assert temp_i.shape == (B, N + 1, F + 1, T)
    assert spat_r.shape == (B, N + 1, 1, D)
    assert spat_i.shape == (B, N + 1, 1, D)
    assert bool(jnp.all(jnp.isfinite(temp_r))) and bool(jnp.all(jnp.isfinite(spat_r)))

    ref = reference_forward(x_real, x_imag, params)
    for got, want in zip(outs, ref):
        err = float(jnp.max(jnp.abs(got - want)))
        assert bool(jnp.allclose(got, want, atol=1e-4, rtol=1e-4)), f"max err {err}"

    print("KERNEL_OK")
</pallas_src>

<mosaic_0001>
module attributes {stable_mosaic.version = 11 : i64} {
  func.func @_fused_affine_kernel(%arg0: i32, %arg1: memref<16x128xf32, #tpu.memory_space<vmem>>, %arg2: memref<2x128x128xf32, #tpu.memory_space<vmem>>, %arg3: memref<2x1x128xf32, #tpu.memory_space<vmem>>, %arg4: memref<16x128xf32, #tpu.memory_space<vmem>>) attributes {dimension_semantics = [#tpu.dimension_semantics<parallel>], iteration_bounds = array<i64: 1>, scalar_prefetch = 0 : i64, scratch_operands = 0 : i64, tpu.core_type = #tpu.core_type<tc>, window_params = [{transform_indices = @transform_0, window_bounds = array<i64: 16, 128>}, {pipeline_mode = #tpu.pipeline_mode<synchronous>, transform_indices = @transform_1, window_bounds = array<i64: 2, 128, 128>}, {pipeline_mode = #tpu.pipeline_mode<synchronous>, transform_indices = @transform_2, window_bounds = array<i64: 2, 1, 128>}, {transform_indices = @transform_3, window_bounds = array<i64: 16, 128>}]} {
    %c0 = arith.constant 0 : index
    %c0_0 = arith.constant 0 : index
    %0 = vector.load %arg1[%c0, %c0_0] : memref<16x128xf32, #tpu.memory_space<vmem>>, vector<16x128xf32>
    %c0_i32 = arith.constant 0 : i32
    %1 = arith.index_cast %c0_i32 : i32 to index
    %c0_1 = arith.constant 0 : index
    %c0_2 = arith.constant 0 : index
    %2 = vector.load %arg2[%1, %c0_1, %c0_2] : memref<2x128x128xf32, #tpu.memory_space<vmem>>, vector<1x128x128xf32>
    %3 = vector.shape_cast %2 : vector<1x128x128xf32> to vector<128x128xf32>
    %cst = arith.constant dense<0.000000e+00> : vector<16x128xf32>
    %4 = tpu.matmul %0, %3, %cst {dimension_numbers = #tpu.dot_dimension_numbers<[1], [0], [0], [1], [0, 0, 1, 1], [], []>} : vector<16x128xf32>, vector<128x128xf32>, vector<16x128xf32> -> vector<16x128xf32>
    %5 = arith.index_cast %c0_i32 : i32 to index
    %c0_3 = arith.constant 0 : index
    %c0_4 = arith.constant 0 : index
    %6 = vector.load %arg3[%5, %c0_3, %c0_4] : memref<2x1x128xf32, #tpu.memory_space<vmem>>, vector<1x1x128xf32>
    %7 = vector.shape_cast %6 : vector<1x1x128xf32> to vector<1x128xf32>
    %8 = vector.broadcast %7 : vector<1x128xf32> to vector<16x128xf32>
    %9 = arith.addf %4, %8 : vector<16x128xf32>
    %c1_i32 = arith.constant 1 : i32
    %10 = arith.index_cast %c1_i32 : i32 to index
    %c0_5 = arith.constant 0 : index
    %c0_6 = arith.constant 0 : index
    %11 = vector.load %arg2[%10, %c0_5, %c0_6] : memref<2x128x128xf32, #tpu.memory_space<vmem>>, vector<1x128x128xf32>
    %12 = vector.shape_cast %11 : vector<1x128x128xf32> to vector<128x128xf32>
    %cst_7 = arith.constant dense<0.000000e+00> : vector<16x128xf32>
    %13 = tpu.matmul %9, %12, %cst_7 {dimension_numbers = #tpu.dot_dimension_numbers<[1], [0], [0], [1], [0, 0, 1, 1], [], []>} : vector<16x128xf32>, vector<128x128xf32>, vector<16x128xf32> -> vector<16x128xf32>
    %14 = arith.index_cast %c1_i32 : i32 to index
    %c0_8 = arith.constant 0 : index
    %c0_9 = arith.constant 0 : index
    %15 = vector.load %arg3[%14, %c0_8, %c0_9] : memref<2x1x128xf32, #tpu.memory_space<vmem>>, vector<1x1x128xf32>
    %16 = vector.shape_cast %15 : vector<1x1x128xf32> to vector<1x128xf32>
    %17 = vector.broadcast %16 : vector<1x128xf32> to vector<16x128xf32>
    %18 = arith.addf %13, %17 : vector<16x128xf32>
    %c2_i32 = arith.constant 2 : i32
    %c0_10 = arith.constant 0 : index
    %c0_11 = arith.constant 0 : index
    %19 = vector.load %arg4[%c0_10, %c0_11] : memref<16x128xf32, #tpu.memory_space<vmem>>, vector<16x128xf32>
    tpu.vector_store %arg4[%c0_10, %c0_11], %18 {strides = array<i32>} : memref<16x128xf32, #tpu.memory_space<vmem>>, vector<16x128xf32>,
    return
  }
  func.func @transform_0(%arg0: i32) -> (i32, i32) {
    %c0_i32 = arith.constant 0 : i32
    %c0_i32_0 = arith.constant 0 : i32
    return %arg0, %c0_i32 : i32, i32
  }
  func.func @transform_1(%arg0: i32) -> (i32, i32, i32) {
    %c0_i32 = arith.constant 0 : i32
    %c0_i32_0 = arith.constant 0 : i32
    %c0_i32_1 = arith.constant 0 : i32
    %c0_i32_2 = arith.constant 0 : i32
    return %c0_i32, %c0_i32_0, %c0_i32_1 : i32, i32, i32
  }
  func.func @transform_2(%arg0: i32) -> (i32, i32, i32) {
    %c0_i32 = arith.constant 0 : i32
    %c0_i32_0 = arith.constant 0 : i32
    %c0_i32_1 = arith.constant 0 : i32
    %c0_i32_2 = arith.constant 0 : i32
    return %c0_i32, %c0_i32_0, %c0_i32_1 : i32, i32, i32
  }
  func.func @transform_3(%arg0: i32) -> (i32, i32) {
    %c0_i32 = arith.constant 0 : i32
    %c0_i32_0 = arith.constant 0 : i32
    return %arg0, %c0_i32 : i32, i32
  }
}

</mosaic_0001>

<bundles_post_ra>
// kernel: squeeze.2
= control target key start
LH: loop header
LB: loop body
LE: loop exit
PB: predicated region body
PF: predicated region fallthrough
CT: control target
= control target key end

     0   :  { %vm3_vm0 = vcmask 130048   ;;  %s34_s0 = inlined_call_operand.vmem [shape: f32[2,5,1,16], index: 0, kind: input, shape index: {}]   ;;  %s35_s1 = inlined_call_operand.vmem [shape: f32[10,16], index: 1, kind: output, shape index: {}]  }
   0x1   :  { %v2_v0 = vld [vmem:[%s34_s0] sm:$0x1f]   ;;  %v10_v1 = vld [vmem:[%s34_s0 + $0x8] sm:$0x1f]  }
   0x2   :  { %4 = vst.msk [vmem:[%s35_s1] sm:$0x1f] %vm3_vm0, %v2_v0   ;;  %11 = vst.msk [vmem:[%s35_s1 + $0x5] sm:$0x1f] %vm3_vm0, %v10_v1  }

// kernel: wavelet_tf_forward.1
= control target key start
LH: loop header
LB: loop body
LE: loop exit
PB: predicated region body
PF: predicated region fallthrough
CT: control target
= control target key end

     0   :  { %s543_s1 = inlined_call_operand.vmem [shape: f32[2,128,128], index: 1, kind: input, shape index: {}]   ;;  %s544_s0 = inlined_call_operand.vmem [shape: f32[16,128], index: 0, kind: input, shape index: {}, may-alias: {0,3}]   ;;  %s545_s2 = inlined_call_operand.vmem [shape: f32[2,1,128], index: 2, kind: input, shape index: {}]   ;;  %s546_s3 = inlined_call_operand.vmem [shape: f32[16,128], index: 3, kind: output, shape index: {}, may-alias: {0,3}]  }
   0x1   :  { %v16_v0 = vld [vmem:[%s543_s1] sm:$0xff]  ;;  %v17_v1 = vld [vmem:[%s543_s1 + $0x8] sm:$0xff]  ;;  %v18_v2 = vld [vmem:[%s543_s1 + $0x10] sm:$0xff] }
   0x2   :  { %v345_v3 = vpack.c.bf16 %v17_v1, %v16_v0  ;;  %v19_v4 = vld [vmem:[%s543_s1 + $0x18] sm:$0xff]  ;;  %v20_v6 = vld [vmem:[%s543_s1 + $0x20] sm:$0xff]  ;;  %v21_v7 = vld [vmem:[%s543_s1 + $0x28] sm:$0xff] }
   0x3   :  { %v349_v5 = vpack.c.bf16 %v19_v4, %v18_v2  ;;  %v353_v8 = vpack.c.bf16 %v21_v7, %v20_v6  ;;  %v22_v9 = vld [vmem:[%s543_s1 + $0x30] sm:$0xff]  ;;  %v23_v10 = vld [vmem:[%s543_s1 + $0x38] sm:$0xff]  ;;  %v14_v11 = vld [vmem:[%s544_s0] sm:$0xff] }
   0x4   :  { %346 = vmatprep.subr.bf16.mxu0 %v345_v3  ;;  %307 = vmatprep.mubr.f32.mxu0 %v14_v11  ;;  %v221_v12 = vld [vmem:[%s543_s1 + $0x80] sm:$0xff]  ;;  %v222_v13 = vld [vmem:[%s543_s1 + $0x88] sm:$0xff]  ;;  %v223_v14 = vld [vmem:[%s543_s1 + $0x90] sm:$0xff]  ;;  %v357_v20 = vpack.c.bf16 %v23_v10, %v22_v9 }
   0x5   :  { %348 = vmatpush3.bf16.msra.mxu0 %v345_v3  ;;  %v377_v15 = vpack.c.bf16 %v222_v13, %v221_v12  ;;  %v224_v16 = vld [vmem:[%s543_s1 + $0x98] sm:$0xff]  ;;  %v225_v18 = vld [vmem:[%s543_s1 + $0xa0] sm:$0xff]  ;;  %v226_v19 = vld [vmem:[%s543_s1 + $0xa8] sm:$0xff] }
   0x6   :  { %350 = vmatprep.subr.bf16.mxu0 %v349_v5  ;;  %v381_v17 = vpack.c.bf16 %v224_v16, %v223_v14  ;;  %v24_v21 = vld [vmem:[%s543_s1 + $0x40] sm:$0xff]  ;;  %v25_v22 = vld [vmem:[%s543_s1 + $0x48] sm:$0xff]  ;;  %v385_v23 = vpack.c.bf16 %v226_v19, %v225_v18  ;;  %v227_v24 = vld [vmem:[%s543_s1 + $0xb0] sm:$0xff] }
   0x7   :  { %378 = vmatprep.subr.bf16.mxu1 %v377_v15  ;;  %v228_v25 = vld [vmem:[%s543_s1 + $0xb8] sm:$0xff]  ;;  %v361_v26 = vpack.c.bf16 %v25_v22, %v24_v21  ;;  %v26_v27 = vld [vmem:[%s543_s1 + $0x50] sm:$0xff]  ;;  %v229_v30 = vld [vmem:[%s543_s1 + $0xc0] sm:$0xff] }
   0x8   :  { %380 = vmatpush3.bf16.msra.mxu1 %v377_v15  ;;  %v27_v28 = vld [vmem:[%s543_s1 + $0x58] sm:$0xff]  ;;  %v389_v29 = vpack.c.bf16 %v228_v25, %v227_v24  ;;  %v230_v31 = vld [vmem:[%s543_s1 + $0xc8] sm:$0xff]  ;;  %v28_v33 = vld [vmem:[%s543_s1 + $0x60] sm:$0xff] }
   0x9   :  { %352 = vmatpush3.bf16.msra.mxu0 %v349_v5  ;;  %382 = vmatprep.subr.bf16.mxu1 %v381_v17  ;;  %v365_v32 = vpack.c.bf16 %v27_v28, %v26_v27  ;;  %v29_v34 = vld [vmem:[%s543_s1 + $0x68] sm:$0xff]  ;;  %v393_v35 = vpack.c.bf16 %v230_v31, %v229_v30  ;;  %v231_v36 = vld [vmem:[%s543_s1 + $0xd0] sm:$0xff]  ;;  %v232_v37 = vld [vmem:[%s543_s1 + $0xd8] sm:$0xff] }
   0xa   :  { %354 = vmatprep.subr.bf16.mxu0 %v353_v8  ;;  %v369_v38 = vpack.c.bf16 %v29_v34, %v28_v33  ;;  %v30_v39 = vld [vmem:[%s543_s1 + $0x70] sm:$0xff]  ;;  %v31_v40 = vld [vmem:[%s543_s1 + $0x78] sm:$0xff]  ;;  %v397_v41 = vpack.c.bf16 %v232_v37, %v231_v36  ;;  %v233_v42 = vld [vmem:[%s543_s1 + $0xe0] sm:$0xff] }
   0xb   :  { %v234_v43 = vld [vmem:[%s543_s1 + $0xe8] sm:$0xff]  ;;  %v373_v44 = vpack.c.bf16 %v31_v40, %v30_v39  ;;  %v235_v47 = vld [vmem:[%s543_s1 + $0xf0] sm:$0xff]  ;;  %v236_v48 = vld [vmem:[%s543_s1 + $0xf8] sm:$0xff] }
   0xc   :  { %384 = vmatpush3.bf16.msra.mxu1 %v381_v17  ;;  %v401_v45 = vpack.c.bf16 %v234_v43, %v233_v42  ;;  %v15_v46 = vld [vmem:[%s544_s0 + $0x8] sm:$0xff]  ;;  %v405_v49 = vpack.c.bf16 %v236_v48, %v235_v47  ;;  %v220_v50 = vld [vmem:[%s545_s2] ss:$0 sm:$0xff]  ;;  %v238_v55 = vld [vmem:[%s545_s2 + $0x1] ss:$0 sm:$0xff] }
   0xd   :  { %356 = vmatpush3.bf16.msra.mxu0 %v353_v8  ;;  %386 = vmatprep.subr.bf16.mxu1 %v385_v23 }
   0xe   :  { %358 = vmatprep.subr.bf16.mxu0 %v357_v20 }
  0x10   :  { %388 = vmatpush3.bf16.msra.mxu1 %v385_v23 }
  0x11   :  { %360 = vmatpush3.bf16.msra.mxu0 %v357_v20  ;;  %390 = vmatprep.subr.bf16.mxu1 %v389_v29 }
  0x12   :  { %362 = vmatprep.subr.bf16.mxu0 %v361_v26 }
  0x14   :  { %392 = vmatpush3.bf16.msra.mxu1 %v389_v29 }
  0x15   :  { %364 = vmatpush3.bf16.msra.mxu0 %v361_v26  ;;  %394 = vmatprep.subr.bf16.mxu1 %v393_v35 }
  0x16   :  { %366 = vmatprep.subr.bf16.mxu0 %v365_v32 }
  0x18   :  { %396 = vmatpush3.bf16.msra.mxu1 %v393_v35 }
  0x19   :  { %368 = vmatpush3.bf16.msra.mxu0 %v365_v32  ;;  %398 = vmatprep.subr.bf16.mxu1 %v397_v41 }
  0x1a   :  { %370 = vmatprep.subr.bf16.mxu0 %v369_v38 }
  0x1c   :  { %400 = vmatpush3.bf16.msra.mxu1 %v397_v41 }
  0x1d   :  { %372 = vmatpush3.bf16.msra.mxu0 %v369_v38  ;;  %402 = vmatprep.subr.bf16.mxu1 %v401_v45 }
  0x1e   :  { %374 = vmatprep.subr.bf16.mxu0 %v373_v44 }
  0x20   :  { %404 = vmatpush3.bf16.msra.mxu1 %v401_v45 }
  0x21   :  { %376 = vmatpush3.bf16.msra.mxu0 %v373_v44  ;;  %406 = vmatprep.subr.bf16.mxu1 %v405_v49 }
  0x24   :  { %308 = vmatmul.mubr.f32.vlgmr.msra.gmra.mrb[0].mxu0 %v15_v46  ;;  %408 = vmatpush3.bf16.msra.mxu1 %v405_v49 }
  0xf7   :  { %v309_v51 = vpop.f32.mrb[0].mxu0 }
  0xf8   :  { %v105_v52 = vpop.f32.mrb[1].mxu0  ;;  %v111_v54 = vadd.f32 %v309_v51, %v220_v50 }
  0xf9   :  { %v106_v53 = vadd.f32 %v220_v50, %v105_v52 }
  0xfb   :  { %342 = vmatprep.mubr.f32.mxu1 %v106_v53 }
  0xfc   :  { %343 = vmatmul.mubr.f32.vlgmr.msra.gmra.mrb[0].mxu1 %v111_v54 }
 0x1cf   :  { %v344_v56 = vpop.f32.mrb[0].mxu1 }
 0x1d0   :  { %v211_v57 = vadd.f32 %v344_v56, %v238_v55  ;;  %v205_v58 = vpop.f32.mrb[1].mxu1 }
 0x1d1   :  { %v206_v59 = vadd.f32 %v238_v55, %v205_v58 }
 0x1d2   :  { %215 = vst [vmem:[%s546_s3 + $0x8] sm:$0xff] %v211_v57 }
 0x1d3   :  { %214 = vst [vmem:[%s546_s3] sm:$0xff] %v206_v59 }

</bundles_post_ra>
